<compile_context>
chip_gen: v7x
topology: tpu7x:2x2x1
jax: 0.10.0
libtpu: 0.0.40
codegen_flags: <defaults>
</compile_context>

<pallas_src>
import functools

import jax
import jax.numpy as jnp
from jax import lax
from jax.experimental import pallas as pl
from jax.experimental.pallas import tpu as pltpu

TIME_STEPS = 784
RECURRENT_MAX = pow(2.0, 1.0 / TIME_STEPS)
RECURRENT_MIN = pow(0.5, 1.0 / TIME_STEPS)


# --------------------------------------------------------------------------
# Fused kernel: grid = (batch_tiles ["parallel"], time_chunks ["arbitrary"]).
# Hidden-state carries live in VMEM scratch across the time-chunk axis.
# --------------------------------------------------------------------------
def _fused_net_kernel(
    x_ref,        # (t_chunk, BT, in_size)  bf16, time-major input chunk
    w_ih0_ref,    # (in_size, HP)           bf16
    b0_ref,       # (1, HP)                 f32
    whh0_ref,     # (1, HP)                 f32
    w_ih1_ref,    # (HP, HP)                bf16
    b1_ref,       # (1, HP)                 f32
    whh1_ref,     # (1, HP)                 f32
    w_lin_ref,    # (HP, NCP)               bf16
    b_lin_ref,    # (1, NCP)                f32
    out_ref,      # (BT, NCP)               f32
    h0_ref,       # scratch (BT, HP) f32    layer-0 carry
    h1_ref,       # scratch (BT, HP) f32    layer-1 carry
    buf_ref,      # scratch (t_chunk, BT, HP) bf16  shared chunk buffer
    *,
    seq_len,      # true (unpadded) sequence length
    t_chunk,
    unroll,
):
    c = pl.program_id(1)
    _, bt, in_size = x_ref.shape
    hp = h0_ref.shape[1]

    @pl.when(c == 0)
    def _init():
        h0_ref[...] = jnp.zeros_like(h0_ref)
        h1_ref[...] = jnp.zeros_like(h1_ref)

    mask_tail = (seq_len % t_chunk) != 0          # Python-level static branch
    if mask_tail:
        valid = jnp.minimum(seq_len - c * t_chunk, t_chunk)

    # ---- layer-0 input projection: one bf16 MXU matmul, f32 accumulation ----
    x2d = x_ref[...].reshape(t_chunk * bt, in_size)
    pre0 = jnp.dot(x2d, w_ih0_ref[...], preferred_element_type=jnp.float32)
    pre0 = pre0 + b0_ref[...]
    buf_ref[...] = pre0.astype(jnp.bfloat16).reshape(t_chunk, bt, hp)

    # ---- layer-0 recurrence: VPU only, f32 carry, bf16 acts written in place
    whh0 = jnp.broadcast_to(whh0_ref[...], (bt, hp))   # hoisted broadcast

    def body0(t, h):
        h_new = jnp.maximum(buf_ref[t].astype(jnp.float32) + whh0 * h, 0.0)
        if mask_tail:
            h_new = jnp.where(t < valid, h_new, h)
        buf_ref[t] = h_new.astype(jnp.bfloat16)
        return h_new

    h0 = lax.fori_loop(0, t_chunk, body0, h0_ref[...], unroll=unroll)
    h0_ref[...] = h0

    # ---- layer-1 input projection: bf16 matmul, overwrite the SAME buffer ----
    a0 = buf_ref[...].reshape(t_chunk * bt, hp)
    pre1 = jnp.dot(a0, w_ih1_ref[...], preferred_element_type=jnp.float32)
    pre1 = pre1 + b1_ref[...]
    buf_ref[...] = pre1.astype(jnp.bfloat16).reshape(t_chunk, bt, hp)

    # ---- layer-1 recurrence: only the carried state matters ----
    whh1 = jnp.broadcast_to(whh1_ref[...], (bt, hp))

    def body1(t, h):
        h_new = jnp.maximum(buf_ref[t].astype(jnp.float32) + whh1 * h, 0.0)
        if mask_tail:
            h_new = jnp.where(t < valid, h_new, h)
        return h_new

    h1 = lax.fori_loop(0, t_chunk, body1, h1_ref[...], unroll=unroll)
    h1_ref[...] = h1

    # ---- linear head, fused into the last time chunk (lane-dense store) ----
    @pl.when(c == pl.num_programs(1) - 1)
    def _head():
        out_ref[...] = (
            jnp.dot(h1.astype(jnp.bfloat16), w_lin_ref[...],
                    preferred_element_type=jnp.float32)
            + b_lin_ref[...]
        )


# --------------------------------------------------------------------------
# Helpers
# --------------------------------------------------------------------------
def _round_up(x, m):
    return (x + m - 1) // m * m


def _pad_to(a, shape):
    return jnp.pad(a, [(0, s - d) for d, s in zip(a.shape, shape)])


def _two_tensorcores():
    """Only split batch across cores on parts with 2 TensorCores per device."""
    try:
        kind = jax.devices()[0].device_kind.lower()
    except Exception:
        return False
    return any(tag in kind for tag in ("v7", "7x", "v4", "v5p"))


# --------------------------------------------------------------------------
# Net.forward wrapper
# --------------------------------------------------------------------------
def net_forward(params, x_bsf, *, max_chunk=256):
    """x_bsf: (batch, seq, input_size) (batch_first=True) -> (batch, 10)."""
    assert len(params["layers"]) == 2, "fused kernel implements the 2-layer Net"
    x = jnp.asarray(x_bsf, jnp.float32)
    batch, seq, in_size = x.shape
    l0, l1 = params["layers"]
    hidden = l0["w_ih"].shape[1]
    n_classes = params["lin"]["w"].shape[1]

    # Padded, layout-friendly sizes (batch to 16 so bf16 tiles stay aligned).
    HP = _round_up(hidden, 128)
    NCP = _round_up(n_classes, 128)
    BP = _round_up(batch, 16)
    nbt = 2 if (_two_tensorcores() and BP % 32 == 0) else 1
    BT = BP // nbt

    # Time chunking; remainder handled by in-kernel tail masking.
    t_chunk = max(1, min(seq, max_chunk))
    # Keep (bf16 chunk buffer + double-buffered x block) well under v7x's VMEM.
    while t_chunk > 8 and (t_chunk * BT * HP * 2
                           + 2 * t_chunk * BT * in_size * 2) > (40 << 20):
        t_chunk = (t_chunk + 1) // 2
    n_chunks = pl.cdiv(seq, t_chunk)
    seq_pad = n_chunks * t_chunk

    # forward re-applies check_bounds on weight_hh (clamp by max_abs).
    whh0 = jnp.clip(l0["w_hh"], -RECURRENT_MAX, RECURRENT_MAX)
    whh1 = jnp.clip(l1["w_hh"], -RECURRENT_MAX, RECURRENT_MAX)

    # Zero-pad hidden dims (padded hidden units provably stay 0 through relu)
    # and pre-cast the matmul weights to bf16 once on the host.
    w_ih0 = _pad_to(l0["w_ih"], (in_size, HP)).astype(jnp.bfloat16)
    b0 = _pad_to(l0["b_ih"], (1, HP))
    whh0 = _pad_to(whh0, (1, HP))
    w_ih1 = _pad_to(l1["w_ih"], (HP, HP)).astype(jnp.bfloat16)
    b1 = _pad_to(l1["b_ih"], (1, HP))
    whh1 = _pad_to(whh1, (1, HP))
    w_lin = _pad_to(params["lin"]["w"], (HP, NCP)).astype(jnp.bfloat16)
    b_lin = _pad_to(params["lin"]["b"], (1, NCP))

    # Time-major, batch/time padded, bf16 input (halves streamed-input DMA).
    x_tm = jnp.transpose(x, (1, 0, 2))                      # (seq, batch, in)
    x_tm = _pad_to(x_tm, (seq_pad, BP, in_size)).astype(jnp.bfloat16)

    # Explicit VMEM budget from the actual block + scratch sizes.
    blk_bytes = (
        t_chunk * BT * in_size * 2                           # x block (bf16)
        + (in_size * HP + HP * HP + HP * NCP) * 2            # bf16 weights
        + (4 * HP + NCP) * 4                                 # f32 biases / w_hh
        + BT * NCP * 4                                       # out block
    )
    scratch_bytes = 2 * BT * HP * 4 + t_chunk * BT * HP * 2
    vmem_limit = int(min(max(2 * blk_bytes + scratch_bytes + (8 << 20),
                             32 << 20), 64 << 20))

    kernel = functools.partial(
        _fused_net_kernel,
        seq_len=seq, t_chunk=t_chunk, unroll=min(8, t_chunk),
    )

    out = pl.pallas_call(
        kernel,
        out_shape=jax.ShapeDtypeStruct((BP, NCP), jnp.float32),
        grid_spec=pltpu.PrefetchScalarGridSpec(
            num_scalar_prefetch=0,
            grid=(nbt, n_chunks),
            in_specs=[
                pl.BlockSpec((t_chunk, BT, in_size), lambda b, c: (c, b, 0)),
                pl.BlockSpec((in_size, HP), lambda b, c: (0, 0)),
                pl.BlockSpec((1, HP), lambda b, c: (0, 0)),
                pl.BlockSpec((1, HP), lambda b, c: (0, 0)),
                pl.BlockSpec((HP, HP), lambda b, c: (0, 0)),
                pl.BlockSpec((1, HP), lambda b, c: (0, 0)),
                pl.BlockSpec((1, HP), lambda b, c: (0, 0)),
                pl.BlockSpec((HP, NCP), lambda b, c: (0, 0)),
                pl.BlockSpec((1, NCP), lambda b, c: (0, 0)),
            ],
            out_specs=pl.BlockSpec((BT, NCP), lambda b, c: (b, 0)),
            scratch_shapes=[
                pltpu.VMEM((BT, HP), jnp.float32),            # h0 carry
                pltpu.VMEM((BT, HP), jnp.float32),            # h1 carry
                pltpu.VMEM((t_chunk, BT, HP), jnp.bfloat16),  # shared chunk buf
            ],
        ),
        compiler_params=pltpu.CompilerParams(
            dimension_semantics=("parallel", "arbitrary"),
            vmem_limit_bytes=vmem_limit,
        ),
    )(x_tm, w_ih0, b0, whh0, w_ih1, b1, whh1, w_lin, b_lin)

    return out[:batch, :n_classes]


# --------------------------------------------------------------------------
# Pure-JAX reference (for correctness check)
# --------------------------------------------------------------------------
def net_forward_ref(params, x_bsf):
    x = jnp.transpose(jnp.asarray(x_bsf, jnp.float32), (1, 0, 2))  # (seq, b, f)
    for layer in params["layers"]:
        w_ih, b_ih = layer["w_ih"], layer["b_ih"]
        w_hh = jnp.clip(layer["w_hh"], -RECURRENT_MAX, RECURRENT_MAX)

        def step(h, xt, w_ih=w_ih, b_ih=b_ih, w_hh=w_hh):
            h = jax.nn.relu(xt @ w_ih + b_ih + w_hh * h)
            return h, h

        h0 = jnp.zeros((x.shape[1], w_ih.shape[1]), jnp.float32)
        _, x = jax.lax.scan(step, h0, x)
    return x[-1] @ params["lin"]["w"] + params["lin"]["b"]


# --------------------------------------------------------------------------
# Parameter construction (matches IndRNNCell.reset_parameters / Net.__init__)
# --------------------------------------------------------------------------
def init_params(key, input_size, hidden_size, n_layer=2, n_classes=10):
    params = {"layers": []}
    for i in range(n_layer):
        in_size = input_size if i == 0 else hidden_size
        key, k_ih, k_hh = jax.random.split(key, 3)
        # weight_ih ~ N(0, 0.01), stored transposed as (in_size, hidden)
        w_ih = 0.01 * jax.random.normal(k_ih, (in_size, hidden_size), jnp.float32)
        # recurrent_inits: layers 0..n-2 ~ U(0, RECURRENT_MAX),
        #                  last layer    ~ U(RECURRENT_MIN, RECURRENT_MAX)
        lo, hi = (0.0, RECURRENT_MAX) if i < n_layer - 1 else (RECURRENT_MIN, RECURRENT_MAX)
        w_hh = jax.random.uniform(k_hh, (hidden_size,), jnp.float32, lo, hi)
        # check_bounds(min_abs=0 -> skipped, max_abs=RECURRENT_MAX -> clamp)
        w_hh = jnp.clip(w_hh, -RECURRENT_MAX, RECURRENT_MAX)
        b_ih = jnp.zeros((hidden_size,), jnp.float32)
        params["layers"].append(
            {"w_ih": w_ih, "w_hh": w_hh.reshape(1, -1), "b_ih": b_ih.reshape(1, -1)}
        )
    key, k_lin = jax.random.split(key)
    # lin.weight ~ N(0, 0.01) shape (10, hidden); stored transposed (hidden, 10)
    w_lin = 0.01 * jax.random.normal(k_lin, (hidden_size, n_classes), jnp.float32)
    b_lin = jnp.full((1, n_classes), 0.1, jnp.float32)
    params["lin"] = {"w": w_lin, "b": b_lin}
    return params


if __name__ == "__main__":
    batch, seq, input_size, hidden_size = 2, 8, 4, 32

    key = jax.random.PRNGKey(0)
    key, k_x = jax.random.split(key)
    x = jax.random.normal(k_x, (batch, seq, input_size), jnp.float32)
    params = init_params(key, input_size, hidden_size, n_layer=2, n_classes=10)

    ref = jax.block_until_ready(net_forward_ref(params, x))

    # Default (single-chunk) config.
    out = jax.block_until_ready(net_forward(params, x))
    assert out.shape == (batch, 10), out.shape
    assert bool(jnp.all(jnp.isfinite(out)))
    assert bool(jnp.allclose(out, ref, atol=2e-3, rtol=2e-2))

    # Multi-chunk config (exercises the carried hidden state across grid steps).
    out2 = jax.block_until_ready(net_forward(params, x, max_chunk=4))
    assert bool(jnp.allclose(out2, ref, atol=2e-3, rtol=2e-2))

    # Remainder config (seq=8, chunk=3 -> exercises the tail-masking path).
    out3 = jax.block_until_ready(net_forward(params, x, max_chunk=3))
    assert bool(jnp.allclose(out3, ref, atol=2e-3, rtol=2e-2))

    print("KERNEL_OK")
</pallas_src>

<mosaic_0001>
module attributes {stable_mosaic.version = 11 : i64} {
  func.func @_fused_net_kernel(%arg0: i32, %arg1: i32, %arg2: memref<8x16x4xbf16, #tpu.memory_space<vmem>>, %arg3: memref<4x128xbf16, #tpu.memory_space<vmem>>, %arg4: memref<1x128xf32, #tpu.memory_space<vmem>>, %arg5: memref<1x128xf32, #tpu.memory_space<vmem>>, %arg6: memref<128x128xbf16, #tpu.memory_space<vmem>>, %arg7: memref<1x128xf32, #tpu.memory_space<vmem>>, %arg8: memref<1x128xf32, #tpu.memory_space<vmem>>, %arg9: memref<128x128xbf16, #tpu.memory_space<vmem>>, %arg10: memref<1x128xf32, #tpu.memory_space<vmem>>, %arg11: memref<16x128xf32, #tpu.memory_space<vmem>>, %arg12: memref<16x128xf32, #tpu.memory_space<vmem>>, %arg13: memref<16x128xf32, #tpu.memory_space<vmem>>, %arg14: memref<8x16x128xbf16, #tpu.memory_space<vmem>>) attributes {dimension_semantics = [#tpu.dimension_semantics<parallel>, #tpu.dimension_semantics<arbitrary>], iteration_bounds = array<i64: 1, 1>, scalar_prefetch = 0 : i64, scratch_operands = 3 : i64, tpu.core_type = #tpu.core_type<tc>, window_params = [{transform_indices = @transform_0, window_bounds = array<i64: 8, 16, 4>}, {pipeline_mode = #tpu.pipeline_mode<synchronous>, transform_indices = @transform_1, window_bounds = array<i64: 4, 128>}, {pipeline_mode = #tpu.pipeline_mode<synchronous>, transform_indices = @transform_2, window_bounds = array<i64: 1, 128>}, {pipeline_mode = #tpu.pipeline_mode<synchronous>, transform_indices = @transform_3, window_bounds = array<i64: 1, 128>}, {pipeline_mode = #tpu.pipeline_mode<synchronous>, transform_indices = @transform_4, window_bounds = array<i64: 128, 128>}, {pipeline_mode = #tpu.pipeline_mode<synchronous>, transform_indices = @transform_5, window_bounds = array<i64: 1, 128>}, {pipeline_mode = #tpu.pipeline_mode<synchronous>, transform_indices = @transform_6, window_bounds = array<i64: 1, 128>}, {pipeline_mode = #tpu.pipeline_mode<synchronous>, transform_indices = @transform_7, window_bounds = array<i64: 128, 128>}, {pipeline_mode = #tpu.pipeline_mode<synchronous>, transform_indices = @transform_8, window_bounds = array<i64: 1, 128>}, {transform_indices = @transform_9, window_bounds = array<i64: 16, 128>}]} {
    %c0_i32 = arith.constant 0 : i32
    %0 = arith.cmpi eq, %arg1, %c0_i32 : i32
    %1 = arith.extui %0 : i1 to i32
    %c0_i32_0 = arith.constant 0 : i32
    %2 = arith.cmpi ne, %1, %c0_i32_0 : i32
    scf.if %2 {
      %cst_109 = arith.constant 0.000000e+00 : f32
      %204 = vector.broadcast %cst_109 : f32 to vector<16x128xf32>
      %c0_110 = arith.constant 0 : index
      %c0_111 = arith.constant 0 : index
      %205 = vector.load %arg12[%c0_110, %c0_111] : memref<16x128xf32, #tpu.memory_space<vmem>>, vector<16x128xf32>
      tpu.vector_store %arg12[%c0_110, %c0_111], %204 {strides = array<i32>} : memref<16x128xf32, #tpu.memory_space<vmem>>, vector<16x128xf32>,
      %cst_112 = arith.constant 0.000000e+00 : f32
      %206 = vector.broadcast %cst_112 : f32 to vector<16x128xf32>
      %c0_113 = arith.constant 0 : index
      %c0_114 = arith.constant 0 : index
      %207 = vector.load %arg13[%c0_113, %c0_114] : memref<16x128xf32, #tpu.memory_space<vmem>>, vector<16x128xf32>
      tpu.vector_store %arg13[%c0_113, %c0_114], %206 {strides = array<i32>} : memref<16x128xf32, #tpu.memory_space<vmem>>, vector<16x128xf32>,
    } else {
    }
    %c0 = arith.constant 0 : index
    %c0_1 = arith.constant 0 : index
    %c0_2 = arith.constant 0 : index
    %3 = vector.load %arg2[%c0, %c0_1, %c0_2] : memref<8x16x4xbf16, #tpu.memory_space<vmem>>, vector<8x16x4xbf16>
    %4 = vector.shape_cast %3 : vector<8x16x4xbf16> to vector<128x4xbf16>
    %c0_3 = arith.constant 0 : index
    %c0_4 = arith.constant 0 : index
    %5 = vector.load %arg3[%c0_3, %c0_4] : memref<4x128xbf16, #tpu.memory_space<vmem>>, vector<4x128xbf16>
    %cst = arith.constant dense<0.000000e+00> : vector<128x128xf32>
    %6 = tpu.matmul %4, %5, %cst {dimension_numbers = #tpu.dot_dimension_numbers<[1], [0], [0], [1], [0, 0, 1, 1], [], []>} : vector<128x4xbf16>, vector<4x128xbf16>, vector<128x128xf32> -> vector<128x128xf32>
    %c0_5 = arith.constant 0 : index
    %c0_6 = arith.constant 0 : index
    %7 = vector.load %arg4[%c0_5, %c0_6] : memref<1x128xf32, #tpu.memory_space<vmem>>, vector<1x128xf32>
    %8 = vector.broadcast %7 : vector<1x128xf32> to vector<128x128xf32>
    %9 = arith.addf %6, %8 : vector<128x128xf32>
    %10 = arith.truncf %9 : vector<128x128xf32> to vector<128x128xbf16>
    %11 = vector.shape_cast %10 : vector<128x128xbf16> to vector<8x16x128xbf16>
    %c0_7 = arith.constant 0 : index
    %c0_8 = arith.constant 0 : index
    %c0_9 = arith.constant 0 : index
    %12 = vector.load %arg14[%c0_7, %c0_8, %c0_9] : memref<8x16x128xbf16, #tpu.memory_space<vmem>>, vector<8x16x128xbf16>
    tpu.vector_store %arg14[%c0_7, %c0_8, %c0_9], %11 {strides = array<i32>} : memref<8x16x128xbf16, #tpu.memory_space<vmem>>, vector<8x16x128xbf16>,
    %c0_10 = arith.constant 0 : index
    %c0_11 = arith.constant 0 : index
    %13 = vector.load %arg5[%c0_10, %c0_11] : memref<1x128xf32, #tpu.memory_space<vmem>>, vector<1x128xf32>
    %14 = vector.shape_cast %13 : vector<1x128xf32> to vector<1x128xf32>
    %15 = vector.broadcast %14 : vector<1x128xf32> to vector<16x128xf32>
    %c0_12 = arith.constant 0 : index
    %c0_13 = arith.constant 0 : index
    %16 = vector.load %arg12[%c0_12, %c0_13] : memref<16x128xf32, #tpu.memory_space<vmem>>, vector<16x128xf32>
    %c0_i32_14 = arith.constant 0 : i32
    %17 = arith.index_cast %c0_i32_14 : i32 to index
    %c0_15 = arith.constant 0 : index
    %c0_16 = arith.constant 0 : index
    %18 = vector.load %arg14[%17, %c0_15, %c0_16] : memref<8x16x128xbf16, #tpu.memory_space<vmem>>, vector<1x16x128xbf16>
    %19 = vector.shape_cast %18 : vector<1x16x128xbf16> to vector<16x128xbf16>
    %20 = arith.extf %19 : vector<16x128xbf16> to vector<16x128xf32>
    %21 = arith.mulf %15, %16 : vector<16x128xf32>
    %22 = arith.addf %20, %21 : vector<16x128xf32>
    %cst_17 = arith.constant 0.000000e+00 : f32
    %23 = vector.broadcast %cst_17 : f32 to vector<16x128xf32>
    %24 = arith.maximumf %22, %23 : vector<16x128xf32>
    %25 = arith.truncf %24 : vector<16x128xf32> to vector<16x128xbf16>
    %26 = arith.index_cast %c0_i32_14 : i32 to index
    %c0_18 = arith.constant 0 : index
    %c0_19 = arith.constant 0 : index
    %27 = vector.load %arg14[%26, %c0_18, %c0_19] : memref<8x16x128xbf16, #tpu.memory_space<vmem>>, vector<1x16x128xbf16>
    %28 = vector.shape_cast %27 : vector<1x16x128xbf16> to vector<16x128xbf16>
    %29 = vector.shape_cast %25 : vector<16x128xbf16> to vector<1x16x128xbf16>
    tpu.vector_store %arg14[%26, %c0_18, %c0_19], %29 {strides = array<i32>} : memref<8x16x128xbf16, #tpu.memory_space<vmem>>, vector<1x16x128xbf16>,
    %c1_i32 = arith.constant 1 : i32
    %30 = arith.index_cast %c1_i32 : i32 to index
    %c0_20 = arith.constant 0 : index
    %c0_21 = arith.constant 0 : index
    %31 = vector.load %arg14[%30, %c0_20, %c0_21] : memref<8x16x128xbf16, #tpu.memory_space<vmem>>, vector<1x16x128xbf16>
    %32 = vector.shape_cast %31 : vector<1x16x128xbf16> to vector<16x128xbf16>
    %33 = arith.extf %32 : vector<16x128xbf16> to vector<16x128xf32>
    %34 = arith.mulf %15, %24 : vector<16x128xf32>
    %35 = arith.addf %33, %34 : vector<16x128xf32>
    %cst_22 = arith.constant 0.000000e+00 : f32
    %36 = vector.broadcast %cst_22 : f32 to vector<16x128xf32>
    %37 = arith.maximumf %35, %36 : vector<16x128xf32>
    %38 = arith.truncf %37 : vector<16x128xf32> to vector<16x128xbf16>
    %39 = arith.index_cast %c1_i32 : i32 to index
    %c0_23 = arith.constant 0 : index
    %c0_24 = arith.constant 0 : index
    %40 = vector.load %arg14[%39, %c0_23, %c0_24] : memref<8x16x128xbf16, #tpu.memory_space<vmem>>, vector<1x16x128xbf16>
    %41 = vector.shape_cast %40 : vector<1x16x128xbf16> to vector<16x128xbf16>
    %42 = vector.shape_cast %38 : vector<16x128xbf16> to vector<1x16x128xbf16>
    tpu.vector_store %arg14[%39, %c0_23, %c0_24], %42 {strides = array<i32>} : memref<8x16x128xbf16, #tpu.memory_space<vmem>>, vector<1x16x128xbf16>,
    %c2_i32 = arith.constant 2 : i32
    %43 = arith.index_cast %c2_i32 : i32 to index
    %c0_25 = arith.constant 0 : index
    %c0_26 = arith.constant 0 : index
    %44 = vector.load %arg14[%43, %c0_25, %c0_26] : memref<8x16x128xbf16, #tpu.memory_space<vmem>>, vector<1x16x128xbf16>
    %45 = vector.shape_cast %44 : vector<1x16x128xbf16> to vector<16x128xbf16>
    %46 = arith.extf %45 : vector<16x128xbf16> to vector<16x128xf32>
    %47 = arith.mulf %15, %37 : vector<16x128xf32>
    %48 = arith.addf %46, %47 : vector<16x128xf32>
    %cst_27 = arith.constant 0.000000e+00 : f32
    %49 = vector.broadcast %cst_27 : f32 to vector<16x128xf32>
    %50 = arith.maximumf %48, %49 : vector<16x128xf32>
    %51 = arith.truncf %50 : vector<16x128xf32> to vector<16x128xbf16>
    %52 = arith.index_cast %c2_i32 : i32 to index
    %c0_28 = arith.constant 0 : index
    %c0_29 = arith.constant 0 : index
    %53 = vector.load %arg14[%52, %c0_28, %c0_29] : memref<8x16x128xbf16, #tpu.memory_space<vmem>>, vector<1x16x128xbf16>
    %54 = vector.shape_cast %53 : vector<1x16x128xbf16> to vector<16x128xbf16>
    %55 = vector.shape_cast %51 : vector<16x128xbf16> to vector<1x16x128xbf16>
    tpu.vector_store %arg14[%52, %c0_28, %c0_29], %55 {strides = array<i32>} : memref<8x16x128xbf16, #tpu.memory_space<vmem>>, vector<1x16x128xbf16>,
    %c3_i32 = arith.constant 3 : i32
    %56 = arith.index_cast %c3_i32 : i32 to index
    %c0_30 = arith.constant 0 : index
    %c0_31 = arith.constant 0 : index
    %57 = vector.load %arg14[%56, %c0_30, %c0_31] : memref<8x16x128xbf16, #tpu.memory_space<vmem>>, vector<1x16x128xbf16>
    %58 = vector.shape_cast %57 : vector<1x16x128xbf16> to vector<16x128xbf16>
    %59 = arith.extf %58 : vector<16x128xbf16> to vector<16x128xf32>
    %60 = arith.mulf %15, %50 : vector<16x128xf32>
    %61 = arith.addf %59, %60 : vector<16x128xf32>
    %cst_32 = arith.constant 0.000000e+00 : f32
    %62 = vector.broadcast %cst_32 : f32 to vector<16x128xf32>
    %63 = arith.maximumf %61, %62 : vector<16x128xf32>
    %64 = arith.truncf %63 : vector<16x128xf32> to vector<16x128xbf16>
    %65 = arith.index_cast %c3_i32 : i32 to index
    %c0_33 = arith.constant 0 : index
    %c0_34 = arith.constant 0 : index
    %66 = vector.load %arg14[%65, %c0_33, %c0_34] : memref<8x16x128xbf16, #tpu.memory_space<vmem>>, vector<1x16x128xbf16>
    %67 = vector.shape_cast %66 : vector<1x16x128xbf16> to vector<16x128xbf16>
    %68 = vector.shape_cast %64 : vector<16x128xbf16> to vector<1x16x128xbf16>
    tpu.vector_store %arg14[%65, %c0_33, %c0_34], %68 {strides = array<i32>} : memref<8x16x128xbf16, #tpu.memory_space<vmem>>, vector<1x16x128xbf16>,
    %c4_i32 = arith.constant 4 : i32
    %69 = arith.index_cast %c4_i32 : i32 to index
    %c0_35 = arith.constant 0 : index
    %c0_36 = arith.constant 0 : index
    %70 = vector.load %arg14[%69, %c0_35, %c0_36] : memref<8x16x128xbf16, #tpu.memory_space<vmem>>, vector<1x16x128xbf16>
    %71 = vector.shape_cast %70 : vector<1x16x128xbf16> to vector<16x128xbf16>
    %72 = arith.extf %71 : vector<16x128xbf16> to vector<16x128xf32>
    %73 = arith.mulf %15, %63 : vector<16x128xf32>
    %74 = arith.addf %72, %73 : vector<16x128xf32>
    %cst_37 = arith.constant 0.000000e+00 : f32
    %75 = vector.broadcast %cst_37 : f32 to vector<16x128xf32>
    %76 = arith.maximumf %74, %75 : vector<16x128xf32>
    %77 = arith.truncf %76 : vector<16x128xf32> to vector<16x128xbf16>
    %78 = arith.index_cast %c4_i32 : i32 to index
    %c0_38 = arith.constant 0 : index
    %c0_39 = arith.constant 0 : index
    %79 = vector.load %arg14[%78, %c0_38, %c0_39] : memref<8x16x128xbf16, #tpu.memory_space<vmem>>, vector<1x16x128xbf16>
    %80 = vector.shape_cast %79 : vector<1x16x128xbf16> to vector<16x128xbf16>
    %81 = vector.shape_cast %77 : vector<16x128xbf16> to vector<1x16x128xbf16>
    tpu.vector_store %arg14[%78, %c0_38, %c0_39], %81 {strides = array<i32>} : memref<8x16x128xbf16, #tpu.memory_space<vmem>>, vector<1x16x128xbf16>,
    %c5_i32 = arith.constant 5 : i32
    %82 = arith.index_cast %c5_i32 : i32 to index
    %c0_40 = arith.constant 0 : index
    %c0_41 = arith.constant 0 : index
    %83 = vector.load %arg14[%82, %c0_40, %c0_41] : memref<8x16x128xbf16, #tpu.memory_space<vmem>>, vector<1x16x128xbf16>
    %84 = vector.shape_cast %83 : vector<1x16x128xbf16> to vector<16x128xbf16>
    %85 = arith.extf %84 : vector<16x128xbf16> to vector<16x128xf32>
    %86 = arith.mulf %15, %76 : vector<16x128xf32>
    %87 = arith.addf %85, %86 : vector<16x128xf32>
    %cst_42 = arith.constant 0.000000e+00 : f32
    %88 = vector.broadcast %cst_42 : f32 to vector<16x128xf32>
    %89 = arith.maximumf %87, %88 : vector<16x128xf32>
    %90 = arith.truncf %89 : vector<16x128xf32> to vector<16x128xbf16>
    %91 = arith.index_cast %c5_i32 : i32 to index
    %c0_43 = arith.constant 0 : index
    %c0_44 = arith.constant 0 : index
    %92 = vector.load %arg14[%91, %c0_43, %c0_44] : memref<8x16x128xbf16, #tpu.memory_space<vmem>>, vector<1x16x128xbf16>
    %93 = vector.shape_cast %92 : vector<1x16x128xbf16> to vector<16x128xbf16>
    %94 = vector.shape_cast %90 : vector<16x128xbf16> to vector<1x16x128xbf16>
    tpu.vector_store %arg14[%91, %c0_43, %c0_44], %94 {strides = array<i32>} : memref<8x16x128xbf16, #tpu.memory_space<vmem>>, vector<1x16x128xbf16>,
    %c6_i32 = arith.constant 6 : i32
    %95 = arith.index_cast %c6_i32 : i32 to index
    %c0_45 = arith.constant 0 : index
    %c0_46 = arith.constant 0 : index
    %96 = vector.load %arg14[%95, %c0_45, %c0_46] : memref<8x16x128xbf16, #tpu.memory_space<vmem>>, vector<1x16x128xbf16>
    %97 = vector.shape_cast %96 : vector<1x16x128xbf16> to vector<16x128xbf16>
    %98 = arith.extf %97 : vector<16x128xbf16> to vector<16x128xf32>
    %99 = arith.mulf %15, %89 : vector<16x128xf32>
    %100 = arith.addf %98, %99 : vector<16x128xf32>
    %cst_47 = arith.constant 0.000000e+00 : f32
    %101 = vector.broadcast %cst_47 : f32 to vector<16x128xf32>
    %102 = arith.maximumf %100, %101 : vector<16x128xf32>
    %103 = arith.truncf %102 : vector<16x128xf32> to vector<16x128xbf16>
    %104 = arith.index_cast %c6_i32 : i32 to index
    %c0_48 = arith.constant 0 : index
    %c0_49 = arith.constant 0 : index
    %105 = vector.load %arg14[%104, %c0_48, %c0_49] : memref<8x16x128xbf16, #tpu.memory_space<vmem>>, vector<1x16x128xbf16>
    %106 = vector.shape_cast %105 : vector<1x16x128xbf16> to vector<16x128xbf16>
    %107 = vector.shape_cast %103 : vector<16x128xbf16> to vector<1x16x128xbf16>
    tpu.vector_store %arg14[%104, %c0_48, %c0_49], %107 {strides = array<i32>} : memref<8x16x128xbf16, #tpu.memory_space<vmem>>, vector<1x16x128xbf16>,
    %c7_i32 = arith.constant 7 : i32
    %108 = arith.index_cast %c7_i32 : i32 to index
    %c0_50 = arith.constant 0 : index
    %c0_51 = arith.constant 0 : index
    %109 = vector.load %arg14[%108, %c0_50, %c0_51] : memref<8x16x128xbf16, #tpu.memory_space<vmem>>, vector<1x16x128xbf16>
    %110 = vector.shape_cast %109 : vector<1x16x128xbf16> to vector<16x128xbf16>
    %111 = arith.extf %110 : vector<16x128xbf16> to vector<16x128xf32>
    %112 = arith.mulf %15, %102 : vector<16x128xf32>
    %113 = arith.addf %111, %112 : vector<16x128xf32>
    %cst_52 = arith.constant 0.000000e+00 : f32
    %114 = vector.broadcast %cst_52 : f32 to vector<16x128xf32>
    %115 = arith.maximumf %113, %114 : vector<16x128xf32>
    %116 = arith.truncf %115 : vector<16x128xf32> to vector<16x128xbf16>
    %117 = arith.index_cast %c7_i32 : i32 to index
    %c0_53 = arith.constant 0 : index
    %c0_54 = arith.constant 0 : index
    %118 = vector.load %arg14[%117, %c0_53, %c0_54] : memref<8x16x128xbf16, #tpu.memory_space<vmem>>, vector<1x16x128xbf16>
    %119 = vector.shape_cast %118 : vector<1x16x128xbf16> to vector<16x128xbf16>
    %120 = vector.shape_cast %116 : vector<16x128xbf16> to vector<1x16x128xbf16>
    tpu.vector_store %arg14[%117, %c0_53, %c0_54], %120 {strides = array<i32>} : memref<8x16x128xbf16, #tpu.memory_space<vmem>>, vector<1x16x128xbf16>,
    %c8_i32 = arith.constant 8 : i32
    %c0_55 = arith.constant 0 : index
    %c0_56 = arith.constant 0 : index
    %121 = vector.load %arg12[%c0_55, %c0_56] : memref<16x128xf32, #tpu.memory_space<vmem>>, vector<16x128xf32>
    tpu.vector_store %arg12[%c0_55, %c0_56], %115 {strides = array<i32>} : memref<16x128xf32, #tpu.memory_space<vmem>>, vector<16x128xf32>,
    %c0_57 = arith.constant 0 : index
    %c0_58 = arith.constant 0 : index
    %c0_59 = arith.constant 0 : index
    %122 = vector.load %arg14[%c0_57, %c0_58, %c0_59] : memref<8x16x128xbf16, #tpu.memory_space<vmem>>, vector<8x16x128xbf16>
    %123 = vector.shape_cast %122 : vector<8x16x128xbf16> to vector<128x128xbf16>
    %c0_60 = arith.constant 0 : index
    %c0_61 = arith.constant 0 : index
    %124 = vector.load %arg6[%c0_60, %c0_61] : memref<128x128xbf16, #tpu.memory_space<vmem>>, vector<128x128xbf16>
    %cst_62 = arith.constant dense<0.000000e+00> : vector<128x128xf32>
    %125 = tpu.matmul %123, %124, %cst_62 {dimension_numbers = #tpu.dot_dimension_numbers<[1], [0], [0], [1], [0, 0, 1, 1], [], []>} : vector<128x128xbf16>, vector<128x128xbf16>, vector<128x128xf32> -> vector<128x128xf32>
    %c0_63 = arith.constant 0 : index
    %c0_64 = arith.constant 0 : index
    %126 = vector.load %arg7[%c0_63, %c0_64] : memref<1x128xf32, #tpu.memory_space<vmem>>, vector<1x128xf32>
    %127 = vector.broadcast %126 : vector<1x128xf32> to vector<128x128xf32>
    %128 = arith.addf %125, %127 : vector<128x128xf32>
    %129 = arith.truncf %128 : vector<128x128xf32> to vector<128x128xbf16>
    %130 = vector.shape_cast %129 : vector<128x128xbf16> to vector<8x16x128xbf16>
    %c0_65 = arith.constant 0 : index
    %c0_66 = arith.constant 0 : index
    %c0_67 = arith.constant 0 : index
    %131 = vector.load %arg14[%c0_65, %c0_66, %c0_67] : memref<8x16x128xbf16, #tpu.memory_space<vmem>>, vector<8x16x128xbf16>
    tpu.vector_store %arg14[%c0_65, %c0_66, %c0_67], %130 {strides = array<i32>} : memref<8x16x128xbf16, #tpu.memory_space<vmem>>, vector<8x16x128xbf16>,
    %c0_68 = arith.constant 0 : index
    %c0_69 = arith.constant 0 : index
    %132 = vector.load %arg8[%c0_68, %c0_69] : memref<1x128xf32, #tpu.memory_space<vmem>>, vector<1x128xf32>
    %133 = vector.shape_cast %132 : vector<1x128xf32> to vector<1x128xf32>
    %134 = vector.broadcast %133 : vector<1x128xf32> to vector<16x128xf32>
    %c0_70 = arith.constant 0 : index
    %c0_71 = arith.constant 0 : index
    %135 = vector.load %arg13[%c0_70, %c0_71] : memref<16x128xf32, #tpu.memory_space<vmem>>, vector<16x128xf32>
    %c0_i32_72 = arith.constant 0 : i32
    %136 = arith.index_cast %c0_i32_72 : i32 to index
    %c0_73 = arith.constant 0 : index
    %c0_74 = arith.constant 0 : index
    %137 = vector.load %arg14[%136, %c0_73, %c0_74] : memref<8x16x128xbf16, #tpu.memory_space<vmem>>, vector<1x16x128xbf16>
    %138 = vector.shape_cast %137 : vector<1x16x128xbf16> to vector<16x128xbf16>
    %139 = arith.extf %138 : vector<16x128xbf16> to vector<16x128xf32>
    %140 = arith.mulf %134, %135 : vector<16x128xf32>
    %141 = arith.addf %139, %140 : vector<16x128xf32>
    %cst_75 = arith.constant 0.000000e+00 : f32
    %142 = vector.broadcast %cst_75 : f32 to vector<16x128xf32>
    %143 = arith.maximumf %141, %142 : vector<16x128xf32>
    %c1_i32_76 = arith.constant 1 : i32
    %144 = arith.index_cast %c1_i32_76 : i32 to index
    %c0_77 = arith.constant 0 : index
    %c0_78 = arith.constant 0 : index
    %145 = vector.load %arg14[%144, %c0_77, %c0_78] : memref<8x16x128xbf16, #tpu.memory_space<vmem>>, vector<1x16x128xbf16>
    %146 = vector.shape_cast %145 : vector<1x16x128xbf16> to vector<16x128xbf16>
    %147 = arith.extf %146 : vector<16x128xbf16> to vector<16x128xf32>
    %148 = arith.mulf %134, %143 : vector<16x128xf32>
    %149 = arith.addf %147, %148 : vector<16x128xf32>
    %cst_79 = arith.constant 0.000000e+00 : f32
    %150 = vector.broadcast %cst_79 : f32 to vector<16x128xf32>
    %151 = arith.maximumf %149, %150 : vector<16x128xf32>
    %c2_i32_80 = arith.constant 2 : i32
    %152 = arith.index_cast %c2_i32_80 : i32 to index
    %c0_81 = arith.constant 0 : index
    %c0_82 = arith.constant 0 : index
    %153 = vector.load %arg14[%152, %c0_81, %c0_82] : memref<8x16x128xbf16, #tpu.memory_space<vmem>>, vector<1x16x128xbf16>
    %154 = vector.shape_cast %153 : vector<1x16x128xbf16> to vector<16x128xbf16>
    %155 = arith.extf %154 : vector<16x128xbf16> to vector<16x128xf32>
    %156 = arith.mulf %134, %151 : vector<16x128xf32>
    %157 = arith.addf %155, %156 : vector<16x128xf32>
    %cst_83 = arith.constant 0.000000e+00 : f32
    %158 = vector.broadcast %cst_83 : f32 to vector<16x128xf32>
    %159 = arith.maximumf %157, %158 : vector<16x128xf32>
    %c3_i32_84 = arith.constant 3 : i32
    %160 = arith.index_cast %c3_i32_84 : i32 to index
    %c0_85 = arith.constant 0 : index
    %c0_86 = arith.constant 0 : index
    %161 = vector.load %arg14[%160, %c0_85, %c0_86] : memref<8x16x128xbf16, #tpu.memory_space<vmem>>, vector<1x16x128xbf16>
    %162 = vector.shape_cast %161 : vector<1x16x128xbf16> to vector<16x128xbf16>
    %163 = arith.extf %162 : vector<16x128xbf16> to vector<16x128xf32>
    %164 = arith.mulf %134, %159 : vector<16x128xf32>
    %165 = arith.addf %163, %164 : vector<16x128xf32>
    %cst_87 = arith.constant 0.000000e+00 : f32
    %166 = vector.broadcast %cst_87 : f32 to vector<16x128xf32>
    %167 = arith.maximumf %165, %166 : vector<16x128xf32>
    %c4_i32_88 = arith.constant 4 : i32
    %168 = arith.index_cast %c4_i32_88 : i32 to index
    %c0_89 = arith.constant 0 : index
    %c0_90 = arith.constant 0 : index
    %169 = vector.load %arg14[%168, %c0_89, %c0_90] : memref<8x16x128xbf16, #tpu.memory_space<vmem>>, vector<1x16x128xbf16>
    %170 = vector.shape_cast %169 : vector<1x16x128xbf16> to vector<16x128xbf16>
    %171 = arith.extf %170 : vector<16x128xbf16> to vector<16x128xf32>
    %172 = arith.mulf %134, %167 : vector<16x128xf32>
    %173 = arith.addf %171, %172 : vector<16x128xf32>
    %cst_91 = arith.constant 0.000000e+00 : f32
    %174 = vector.broadcast %cst_91 : f32 to vector<16x128xf32>
    %175 = arith.maximumf %173, %174 : vector<16x128xf32>
    %c5_i32_92 = arith.constant 5 : i32
    %176 = arith.index_cast %c5_i32_92 : i32 to index
    %c0_93 = arith.constant 0 : index
    %c0_94 = arith.constant 0 : index
    %177 = vector.load %arg14[%176, %c0_93, %c0_94] : memref<8x16x128xbf16, #tpu.memory_space<vmem>>, vector<1x16x128xbf16>
    %178 = vector.shape_cast %177 : vector<1x16x128xbf16> to vector<16x128xbf16>
    %179 = arith.extf %178 : vector<16x128xbf16> to vector<16x128xf32>
    %180 = arith.mulf %134, %175 : vector<16x128xf32>
    %181 = arith.addf %179, %180 : vector<16x128xf32>
    %cst_95 = arith.constant 0.000000e+00 : f32
    %182 = vector.broadcast %cst_95 : f32 to vector<16x128xf32>
    %183 = arith.maximumf %181, %182 : vector<16x128xf32>
    %c6_i32_96 = arith.constant 6 : i32
    %184 = arith.index_cast %c6_i32_96 : i32 to index
    %c0_97 = arith.constant 0 : index
    %c0_98 = arith.constant 0 : index
    %185 = vector.load %arg14[%184, %c0_97, %c0_98] : memref<8x16x128xbf16, #tpu.memory_space<vmem>>, vector<1x16x128xbf16>
    %186 = vector.shape_cast %185 : vector<1x16x128xbf16> to vector<16x128xbf16>
    %187 = arith.extf %186 : vector<16x128xbf16> to vector<16x128xf32>
    %188 = arith.mulf %134, %183 : vector<16x128xf32>
    %189 = arith.addf %187, %188 : vector<16x128xf32>
    %cst_99 = arith.constant 0.000000e+00 : f32
    %190 = vector.broadcast %cst_99 : f32 to vector<16x128xf32>
    %191 = arith.maximumf %189, %190 : vector<16x128xf32>
    %c7_i32_100 = arith.constant 7 : i32
    %192 = arith.index_cast %c7_i32_100 : i32 to index
    %c0_101 = arith.constant 0 : index
    %c0_102 = arith.constant 0 : index
    %193 = vector.load %arg14[%192, %c0_101, %c0_102] : memref<8x16x128xbf16, #tpu.memory_space<vmem>>, vector<1x16x128xbf16>
    %194 = vector.shape_cast %193 : vector<1x16x128xbf16> to vector<16x128xbf16>
    %195 = arith.extf %194 : vector<16x128xbf16> to vector<16x128xf32>
    %196 = arith.mulf %134, %191 : vector<16x128xf32>
    %197 = arith.addf %195, %196 : vector<16x128xf32>
    %cst_103 = arith.constant 0.000000e+00 : f32
    %198 = vector.broadcast %cst_103 : f32 to vector<16x128xf32>
    %199 = arith.maximumf %197, %198 : vector<16x128xf32>
    %c8_i32_104 = arith.constant 8 : i32
    %c0_105 = arith.constant 0 : index
    %c0_106 = arith.constant 0 : index
    %200 = vector.load %arg13[%c0_105, %c0_106] : memref<16x128xf32, #tpu.memory_space<vmem>>, vector<16x128xf32>
    tpu.vector_store %arg13[%c0_105, %c0_106], %199 {strides = array<i32>} : memref<16x128xf32, #tpu.memory_space<vmem>>, vector<16x128xf32>,
    %c0_i32_107 = arith.constant 0 : i32
    %201 = arith.cmpi eq, %arg1, %c0_i32_107 : i32
    %202 = arith.extui %201 : i1 to i32
    %c0_i32_108 = arith.constant 0 : i32
    %203 = arith.cmpi ne, %202, %c0_i32_108 : i32
    scf.if %203 {
      %204 = arith.truncf %199 : vector<16x128xf32> to vector<16x128xbf16>
      %c0_109 = arith.constant 0 : index
      %c0_110 = arith.constant 0 : index
      %205 = vector.load %arg9[%c0_109, %c0_110] : memref<128x128xbf16, #tpu.memory_space<vmem>>, vector<128x128xbf16>
      %cst_111 = arith.constant dense<0.000000e+00> : vector<16x128xf32>
      %206 = tpu.matmul %204, %205, %cst_111 {dimension_numbers = #tpu.dot_dimension_numbers<[1], [0], [0], [1], [0, 0, 1, 1], [], []>} : vector<16x128xbf16>, vector<128x128xbf16>, vector<16x128xf32> -> vector<16x128xf32>
      %c0_112 = arith.constant 0 : index
      %c0_113 = arith.constant 0 : index
      %207 = vector.load %arg10[%c0_112, %c0_113] : memref<1x128xf32, #tpu.memory_space<vmem>>, vector<1x128xf32>
      %208 = vector.broadcast %207 : vector<1x128xf32> to vector<16x128xf32>
      %209 = arith.addf %206, %208 : vector<16x128xf32>
      %c0_114 = arith.constant 0 : index
      %c0_115 = arith.constant 0 : index
      %210 = vector.load %arg11[%c0_114, %c0_115] : memref<16x128xf32, #tpu.memory_space<vmem>>, vector<16x128xf32>
      tpu.vector_store %arg11[%c0_114, %c0_115], %209 {strides = array<i32>} : memref<16x128xf32, #tpu.memory_space<vmem>>, vector<16x128xf32>,
    } else {
    }
    return
  }
  func.func @transform_0(%arg0: i32, %arg1: i32) -> (i32, i32, i32) {
    %c0_i32 = arith.constant 0 : i32
    %c0_i32_0 = arith.constant 0 : i32
    return %arg1, %arg0, %c0_i32 : i32, i32, i32
  }
  func.func @transform_1(%arg0: i32, %arg1: i32) -> (i32, i32) {
    %c0_i32 = arith.constant 0 : i32
    %c0_i32_0 = arith.constant 0 : i32
    %c0_i32_1 = arith.constant 0 : i32
    return %c0_i32, %c0_i32_0 : i32, i32
  }
  func.func @transform_2(%arg0: i32, %arg1: i32) -> (i32, i32) {
    %c0_i32 = arith.constant 0 : i32
    %c0_i32_0 = arith.constant 0 : i32
    %c0_i32_1 = arith.constant 0 : i32
    return %c0_i32, %c0_i32_0 : i32, i32
  }
  func.func @transform_3(%arg0: i32, %arg1: i32) -> (i32, i32) {
    %c0_i32 = arith.constant 0 : i32
    %c0_i32_0 = arith.constant 0 : i32
    %c0_i32_1 = arith.constant 0 : i32
    return %c0_i32, %c0_i32_0 : i32, i32
  }
  func.func @transform_4(%arg0: i32, %arg1: i32) -> (i32, i32) {
    %c0_i32 = arith.constant 0 : i32
    %c0_i32_0 = arith.constant 0 : i32
    %c0_i32_1 = arith.constant 0 : i32
    return %c0_i32, %c0_i32_0 : i32, i32
  }
  func.func @transform_5(%arg0: i32, %arg1: i32) -> (i32, i32) {
    %c0_i32 = arith.constant 0 : i32
    %c0_i32_0 = arith.constant 0 : i32
    %c0_i32_1 = arith.constant 0 : i32
    return %c0_i32, %c0_i32_0 : i32, i32
  }
  func.func @transform_6(%arg0: i32, %arg1: i32) -> (i32, i32) {
    %c0_i32 = arith.constant 0 : i32
    %c0_i32_0 = arith.constant 0 : i32
    %c0_i32_1 = arith.constant 0 : i32
    return %c0_i32, %c0_i32_0 : i32, i32
  }
  func.func @transform_7(%arg0: i32, %arg1: i32) -> (i32, i32) {
    %c0_i32 = arith.constant 0 : i32
    %c0_i32_0 = arith.constant 0 : i32
    %c0_i32_1 = arith.constant 0 : i32
    return %c0_i32, %c0_i32_0 : i32, i32
  }
  func.func @transform_8(%arg0: i32, %arg1: i32) -> (i32, i32) {
    %c0_i32 = arith.constant 0 : i32
    %c0_i32_0 = arith.constant 0 : i32
    %c0_i32_1 = arith.constant 0 : i32
    return %c0_i32, %c0_i32_0 : i32, i32
  }
  func.func @transform_9(%arg0: i32, %arg1: i32) -> (i32, i32) {
    %c0_i32 = arith.constant 0 : i32
    %c0_i32_0 = arith.constant 0 : i32
    return %arg0, %c0_i32 : i32, i32
  }
}

</mosaic_0001>

<bundles_post_ra>
// kernel: tpu_custom_call.1
= control target key start
LH: loop header
LB: loop body
LE: loop exit
PB: predicated region body
PF: predicated region fallthrough
CT: control target
= control target key end

     0   :  { %14 = vsyncpa [#allocation6], 0  ;;  %s1226_s0 = inlined_call_operand.vmem [shape: bf16[8,16,4], index: 0, kind: input, shape index: {}]   ;;  %s1227_s1 = inlined_call_operand.vmem [shape: bf16[4,128], index: 1, kind: input, shape index: {}]   ;;  %s1228_s2 = inlined_call_operand.vmem [shape: f32[1,128], index: 2, kind: input, shape index: {}]   ;;  %s1229_s3 = inlined_call_operand.vmem [shape: f32[1,128], index: 3, kind: input, shape index: {}]   ;;  %s1230_s4 = inlined_call_operand.vmem [shape: bf16[128,128], index: 4, kind: input, shape index: {}]   ;;  %s1231_s5 = inlined_call_operand.vmem [shape: f32[1,128], index: 5, kind: input, shape index: {}]   ;;  %s1232_s6 = inlined_call_operand.vmem [shape: f32[1,128], index: 6, kind: input, shape index: {}]   ;;  %s1233_s7 = inlined_call_operand.hbm [shape: bf16[128,128], index: 7, kind: input, shape index: {}]   ;;  %s1234_s8 = inlined_call_operand.vmem [shape: f32[1,128], index: 8, kind: input, shape index: {}]   ;;  %s1235_s9 = inlined_call_operand.hbm [shape: f32[16,128], index: 9, kind: output, shape index: {}]  }
   0x1   :  { %15 = vsyncpa [#allocation7], 0  ;;  %s1000_s30 = smov [#allocation5]   ;;  %s952_s13 = scalar_lea.hbm %s1233_s7, 1024 }
   0x2   :  { %s35_s10 = sshll.u32 %s1000_s30, 4  ;;  %p953_p0 = scmp.ne.s32.totalorder %s1233_s7, %s952_s13  ;;  %s36_s10 = int_to_ptr.vmem [resolvable:$true] %s35_s10 }
   0x3   :  { %p956_p1 = scmp.lt.u32.totalorder %s952_s13, %s1233_s7 }
   0x5   :  { %p958_p2 = pnand %p956_p1, %p953_p0 }
   0x7   :  { %961 = shalt.err (!%p958_p2)
}
   0x8   :  { %s962_s18 = scalar_lea.vmem %s36_s10, 1024  ;;  %p967_p4 = scmp.lt.s32.totalorder %s36_s10, %s36_s10 }
   0x9   :  { %p963_p3 = scmp.ne.s32.totalorder %s36_s10, %s962_s18  ;;  %p968_p5 = scmp.lt.s32.totalorder %s962_s18, %s962_s18 }
   0xb   :  { %p969_p6 = por %p968_p5, %p967_p4 }
   0xd   :  { %p970_p7 = pnand %p969_p6, %p963_p3 }
   0xf   :  { %973 = shalt.err (!%p970_p7)
}
  0x10   :  { %s1001_s19 = smov 64   ;;  %s1002_s20 = smov 4  }
  0x11   :  { %41 = dma.hbm_to_vmem [thread:$0]  %s1233_s7, 1024, %s36_s10, [#allocation6], %s1001_s19, %s1001_s19, %s1002_s20  }
  0x12   :  { %996 = dma.done.wait [#allocation6], 1024  }
  0x13   :  { %997 = vsyncadd [#allocation6], 4294966272  ;;  %vm145_vm0 = vcmask 1041408   ;;  %vm120_vm1 = vcmask 31744   ;;  %v72_v0 = vld [vmem:[%s1227_s1] sm:$0x3] }
  0x14   :  { %919 = vmatprep.subr.msk.bf16.mxu0 %vm145_vm0, %v72_v0  ;;  %v147_v1 = vsel %vm145_vm0, %v72_v0, 0  ;;  %v928_v2 = vld [vmem:[%s1226_s0] sm:$0xff]   ;;  %v929_v3 = vld [vmem:[%s1226_s0 + $0x8] sm:$0xff]   ;;  %v930_v4 = vld [vmem:[%s1226_s0 + $0x10] sm:$0xff]   ;;  %vm1004_vm2 = vmmov 0   ;;  %s1005_s15 = smov [#allocation8]  }
  0x15   :  { %850 = vmatpush3.bf16.msra.mxu0 %v147_v1  ;;  %851 = vmatprep.mubr.msk.bf16.mxu0 %vm120_vm1, %v928_v2  ;;  %v931_v5 = vld [vmem:[%s1226_s0 + $0x18] sm:$0xff]   ;;  %v932_v6 = vld [vmem:[%s1226_s0 + $0x20] sm:$0xff]   ;;  %v937_v8 = vld [vmem:[%s1230_s4 + $0x8] sm:$0xff]   ;;  %s766_s16 = sshll.u32 %s1005_s15, 4  ;;  %s767_s16 = int_to_ptr.vmem [resolvable:$true] %s766_s16 }
  0x16   :  { %v936_v7 = vld [vmem:[%s1230_s4] sm:$0xff]   ;;  %v938_v9 = vld [vmem:[%s1230_s4 + $0x10] sm:$0xff]   ;;  %v933_v10 = vld [vmem:[%s1226_s0 + $0x28] sm:$0xff]   ;;  %s974_s17 = scalar_lea.vmem %s767_s16, 256  ;;  %p979_p9 = scmp.lt.s32.totalorder %s767_s16, %s767_s16 }
  0x17   :  { %867 = vmatprep.subr.bf16.mxu1 %v936_v7  ;;  %v934_v11 = vld [vmem:[%s1226_s0 + $0x30] sm:$0xff]   ;;  %v935_v12 = vld [vmem:[%s1226_s0 + $0x38] sm:$0xff]   ;;  %v940_v14 = vld [vmem:[%s1230_s4 + $0x20] sm:$0xff]   ;;  %p975_p8 = scmp.ne.s32.totalorder %s767_s16, %s974_s17  ;;  %p980_p10 = scmp.lt.s32.totalorder %s974_s17, %s974_s17 }
  0x18   :  { %852 = vmatmul.mubr.msk.bf16.vlgmr.msra.gmra.mrb[0].mxu0 %vm120_vm1, %v929_v3  ;;  %868 = vmatpush3.bf16.msra.mxu1 %v936_v7  ;;  %v939_v13 = vld [vmem:[%s1230_s4 + $0x18] sm:$0xff]   ;;  %v941_v15 = vld [vmem:[%s1230_s4 + $0x28] sm:$0xff]   ;;  %v942_v16 = vld [vmem:[%s1230_s4 + $0x30] sm:$0xff]  }
  0x19   :  { %855 = vmatprep.mubr.msk.bf16.mxu0 %vm120_vm1, %v930_v4  ;;  %869 = vmatprep.subr.bf16.mxu1 %v937_v8  ;;  %v943_v17 = vld [vmem:[%s1230_s4 + $0x38] sm:$0xff]   ;;  %v1132_v19 = vld [vmem:[%s1228_s2] ss:$0 sm:$0xff]  ;;  %p981_p11 = por %p980_p10, %p979_p9 }
  0x1a   :  { %v1139_v25 = vld [vmem:[%s1229_s3] ss:$0 sm:$0xff] }
  0x1b   :  { %v274_v30 = vmul.f32 0.0, %v1139_v25  ;;  %p982_p12 = pnand %p981_p11, %p975_p8 }
  0x1c   :  { %870 = vmatpush3.bf16.msra.mxu1 %v937_v8 }
  0x1d   :  { %871 = vmatprep.subr.bf16.mxu1 %v938_v9 }
  0x20   :  { %856 = vmatmul.mubr.msk.bf16.gmra.mrb[4].mxu0 %vm120_vm1, %v931_v5  ;;  %872 = vmatpush3.bf16.msra.mxu1 %v938_v9 }
  0x21   :  { %859 = vmatprep.mubr.msk.bf16.mxu0 %vm120_vm1, %v932_v6  ;;  %873 = vmatprep.subr.bf16.mxu1 %v939_v13 }
  0x24   :  { %874 = vmatpush3.bf16.msra.mxu1 %v939_v13 }
  0x25   :  { %875 = vmatprep.subr.bf16.mxu1 %v940_v14 }
  0x28   :  { %860 = vmatmul.mubr.msk.bf16.gmra.mrb[8].mxu0 %vm120_vm1, %v933_v10  ;;  %876 = vmatpush3.bf16.msra.mxu1 %v940_v14 }
  0x29   :  { %863 = vmatprep.mubr.msk.bf16.mxu0 %vm120_vm1, %v934_v11  ;;  %877 = vmatprep.subr.bf16.mxu1 %v941_v15 }
  0x2c   :  { %878 = vmatpush3.bf16.msra.mxu1 %v941_v15 }
  0x2d   :  { %879 = vmatprep.subr.bf16.mxu1 %v942_v16 }
  0x30   :  { %864 = vmatmul.mubr.msk.bf16.gmra.mrb[12].mxu0 %vm120_vm1, %v935_v12  ;;  %880 = vmatpush3.bf16.msra.mxu1 %v942_v16 }
  0x31   :  { %881 = vmatprep.subr.bf16.mxu1 %v943_v17 }
  0x34   :  { %882 = vmatpush3.bf16.msra.mxu1 %v943_v17 }
  0xeb   :  { %v853_v18 = vpop.f32.mrb[0].mxu0 }
  0xec   :  { %v183_v20 = vpop.f32.mrb[1].mxu0  ;;  %v192_v22 = vadd.f32 %v853_v18, %v1132_v19 }
  0xed   :  { %v854_v21 = vpop.f32.mrb[2].mxu0  ;;  %v184_v26 = vadd.f32 %v1132_v19, %v183_v20 }
  0xee   :  { %v195_v23 = vadd.f32 %v854_v21, %v1132_v19  ;;  %v186_v24 = vpop.f32.mrb[3].mxu0 }
  0xef   :  { %v187_v27 = vadd.f32 %v1132_v19, %v186_v24 }
  0xf0   :  { %v247_v28 = vpack.c.bf16 %v195_v23, %v192_v22 }
  0xf1   :  { %v246_v29 = vpack.c.bf16 %v187_v27, %v184_v26 }
  0xf2   :  { %v284_v45 = vunpack.c.l.bf16 %v247_v28  ;;  %v285_v46 = vunpack.c.h.bf16 %v247_v28 }
  0xf3   :  { %v857_v31 = vpop.f32.mrb[4].mxu0  ;;  %v272_v32 = vunpack.c.l.bf16 %v246_v29  ;;  %v273_v33 = vunpack.c.h.bf16 %v246_v29 }
  0xf4   :  { %v208_v34 = vadd.f32 %v857_v31, %v1132_v19  ;;  %v199_v35 = vpop.f32.mrb[5].mxu0 }
  0xf5   :  { %v200_v36 = vadd.f32 %v1132_v19, %v199_v35  ;;  %v858_v37 = vpop.f32.mrb[6].mxu0  ;;  %v276_v38 = vadd.f32 %v274_v30, %v272_v32  ;;  %v277_v39 = vadd.f32 %v274_v30, %v273_v33 }
  0xf6   :  { %v211_v40 = vadd.f32 %v858_v37, %v1132_v19  ;;  %v202_v41 = vpop.f32.mrb[7].mxu0 }
  0xf7   :  { %v203_v42 = vadd.f32 %v1132_v19, %v202_v41  ;;  %v278_v43 = vmax.f32 %v276_v38, 0.0  ;;  %v279_v44 = vmax.f32 %v277_v39, 0.0 }
  0xf8   :  { %v249_v47 = vpack.c.bf16 %v211_v40, %v208_v34 }
  0xf9   :  { %v248_v48 = vpack.c.bf16 %v203_v42, %v200_v36  ;;  %v280_v49 = vpack.c.bf16 %v279_v44, %v278_v43  ;;  %v286_v50 = vmul.f32 %v1139_v25, %v278_v43  ;;  %v287_v51 = vmul.f32 %v1139_v25, %v279_v44 }
  0xfa   :  { %v308_v12 = vunpack.c.l.bf16 %v249_v47  ;;  %v309_v13 = vunpack.c.h.bf16 %v249_v47 }
  0xfb   :  { %v288_v52 = vadd.f32 %v286_v50, %v284_v45  ;;  %v289_v53 = vadd.f32 %v287_v51, %v285_v46  ;;  %883 = vmatprep.mubr.bf16.mxu1 %v280_v49  ;;  %v861_v54 = vpop.f32.mrb[8].mxu0  ;;  %v296_v61 = vunpack.c.l.bf16 %v248_v48  ;;  %v297_v62 = vunpack.c.h.bf16 %v248_v48 }
  0xfc   :  { %v224_v55 = vadd.f32 %v861_v54, %v1132_v19  ;;  %v215_v56 = vpop.f32.mrb[9].mxu0 }
  0xfd   :  { %v216_v57 = vadd.f32 %v1132_v19, %v215_v56  ;;  %v290_v58 = vmax.f32 %v288_v52, 0.0  ;;  %v291_v59 = vmax.f32 %v289_v53, 0.0  ;;  %v862_v60 = vpop.f32.mrb[10].mxu0 }
  0xfe   :  { %v227_v63 = vadd.f32 %v862_v60, %v1132_v19  ;;  %v218_v0 = vpop.f32.mrb[11].mxu0 }
  0xff   :  { %v292_v1 = vpack.c.bf16 %v291_v59, %v290_v58  ;;  %v298_v2 = vmul.f32 %v1139_v25, %v290_v58  ;;  %v299_v3 = vmul.f32 %v1139_v25, %v291_v59  ;;  %v219_v4 = vadd.f32 %v1132_v19, %v218_v0 }
 0x100   :  { %v251_v5 = vpack.c.bf16 %v227_v63, %v224_v55 }
 0x101   :  { %884 = vmatmul.mubr.bf16.vlgmr.msra.gmra.mrb[0].mxu1 %v292_v1  ;;  %v250_v6 = vpack.c.bf16 %v219_v4, %v216_v57  ;;  %v300_v7 = vadd.f32 %v298_v2, %v296_v61  ;;  %v301_v8 = vadd.f32 %v299_v3, %v297_v62  ;;  %v944_v4 = vld [vmem:[#allocation5] sm:$0xff]  }
 0x102   :  { %v332_v41 = vunpack.c.l.bf16 %v251_v5  ;;  %v333_v42 = vunpack.c.h.bf16 %v251_v5  ;;  %v1003_v5 = vmov 0.0  }
 0x103   :  { %v302_v9 = vmax.f32 %v300_v7, 0.0  ;;  %v303_v10 = vmax.f32 %v301_v8, 0.0  ;;  %v865_v11 = vpop.f32.mrb[12].mxu0  ;;  %v320_v32 = vunpack.c.l.bf16 %v250_v6  ;;  %v321_v33 = vunpack.c.h.bf16 %v250_v6  ;;  %899 = vmatprep.subr.bf16.mxu0 %v1003_v5  ;;  %v945_v6 = vld [vmem:[#allocation5 + $0x8] sm:$0xff]   ;;  %v946_v7 = vld [vmem:[#allocation5 + $0x10] sm:$0xff]   ;;  %v947_v8 = vld [vmem:[#allocation5 + $0x18] sm:$0xff]   ;;  %915 = vmatprep.mubr.msk.bf16.mxu0 %vm1004_vm2, %v1003_v5 }
 0x104   :  { %v240_v14 = vadd.f32 %v865_v11, %v1132_v19  ;;  %v231_v15 = vpop.f32.mrb[13].mxu0  ;;  %900 = vmatpush3.bf16.msra.mxu0 %v944_v4  ;;  %v951_v11 = vld [vmem:[#allocation5 + $0x38] sm:$0xff]  }
 0x105   :  { %v304_v16 = vpack.c.bf16 %v303_v10, %v302_v9  ;;  %v310_v17 = vmul.f32 %v1139_v25, %v302_v9  ;;  %v311_v18 = vmul.f32 %v1139_v25, %v303_v10  ;;  %v232_v20 = vadd.f32 %v1132_v19, %v231_v15  ;;  %v866_v21 = vpop.f32.mrb[14].mxu0  ;;  %901 = vmatprep.subr.bf16.mxu0 %v1003_v5  ;;  %v949_v9 = vld [vmem:[#allocation5 + $0x28] sm:$0xff]   ;;  %v950_v10 = vld [vmem:[#allocation5 + $0x30] sm:$0xff]  }
 0x106   :  { %v243_v22 = vadd.f32 %v866_v21, %v1132_v19  ;;  %v234_v23 = vpop.f32.mrb[15].mxu0 }
 0x107   :  { %887 = vmatprep.mubr.bf16.mxu1 %v304_v16  ;;  %v312_v24 = vadd.f32 %v310_v17, %v308_v12  ;;  %v313_v26 = vadd.f32 %v311_v18, %v309_v13  ;;  %v235_v27 = vadd.f32 %v1132_v19, %v234_v23  ;;  %v1173_v13 = vld [vmem:[%s1231_s5] ss:$0 sm:$0xff] }
 0x108   :  { %v253_v28 = vpack.c.bf16 %v243_v22, %v240_v14  ;;  %902 = vmatpush3.bf16.msra.mxu0 %v945_v6 }
 0x109   :  { %v314_v29 = vmax.f32 %v312_v24, 0.0  ;;  %v315_v30 = vmax.f32 %v313_v26, 0.0  ;;  %v252_v31 = vpack.c.bf16 %v235_v27, %v232_v20  ;;  %903 = vmatprep.subr.bf16.mxu0 %v1003_v5  ;;  %v1180_v20 = vld [vmem:[%s1232_s6] ss:$0 sm:$0xff] }
 0x10a   :  { %v356_v58 = vunpack.c.l.bf16 %v253_v28  ;;  %v357_v59 = vunpack.c.h.bf16 %v253_v28  ;;  %v572_v26 = vmul.f32 0.0, %v1180_v20 }
 0x10b   :  { %v316_v34 = vpack.c.bf16 %v315_v30, %v314_v29  ;;  %v322_v35 = vmul.f32 %v1139_v25, %v314_v29  ;;  %v323_v36 = vmul.f32 %v1139_v25, %v315_v30  ;;  %v344_v49 = vunpack.c.l.bf16 %v252_v31 }
 0x10c   :  { %v345_v50 = vunpack.c.h.bf16 %v252_v31  ;;  %904 = vmatpush3.bf16.msra.mxu0 %v946_v7 }
 0x10d   :  { %888 = vmatmul.mubr.bf16.gmra.mrb[4].mxu1 %v316_v34  ;;  %v324_v37 = vadd.f32 %v322_v35, %v320_v32  ;;  %v325_v38 = vadd.f32 %v323_v36, %v321_v33  ;;  %905 = vmatprep.subr.bf16.mxu0 %v1003_v5 }
 0x10f   :  { %v326_v39 = vmax.f32 %v324_v37, 0.0  ;;  %v327_v40 = vmax.f32 %v325_v38, 0.0 }
 0x110   :  { %906 = vmatpush3.bf16.msra.mxu0 %v947_v8 }
 0x111   :  { %v328_v43 = vpack.c.bf16 %v327_v40, %v326_v39  ;;  %v334_v19 = vmul.f32 %v1139_v25, %v326_v39  ;;  %v335_v44 = vmul.f32 %v1139_v25, %v327_v40  ;;  %907 = vmatprep.subr.bf16.mxu0 %v1003_v5 }
 0x113   :  { %891 = vmatprep.mubr.bf16.mxu1 %v328_v43  ;;  %v336_v45 = vadd.f32 %v334_v19, %v332_v41  ;;  %v337_v46 = vadd.f32 %v335_v44, %v333_v42 }
 0x115   :  { %v338_v47 = vmax.f32 %v336_v45, 0.0  ;;  %v339_v48 = vmax.f32 %v337_v46, 0.0 }
 0x117   :  { %v340_v51 = vpack.c.bf16 %v339_v48, %v338_v47  ;;  %v346_v52 = vmul.f32 %v1139_v25, %v338_v47  ;;  %v347_v53 = vmul.f32 %v1139_v25, %v339_v48 }
 0x119   :  { %892 = vmatmul.mubr.bf16.gmra.mrb[8].mxu1 %v340_v51  ;;  %v348_v54 = vadd.f32 %v346_v52, %v344_v49  ;;  %v349_v55 = vadd.f32 %v347_v53, %v345_v50 }
 0x11b   :  { %v350_v56 = vmax.f32 %v348_v54, 0.0  ;;  %v351_v57 = vmax.f32 %v349_v55, 0.0 }
 0x11d   :  { %v352_v60 = vpack.c.bf16 %v351_v57, %v350_v56  ;;  %v358_v61 = vmul.f32 %v1139_v25, %v350_v56  ;;  %v359_v62 = vmul.f32 %v1139_v25, %v351_v57  ;;  %v948_v25 = vld [vmem:[#allocation5 + $0x20] sm:$0xff]  }
 0x11e   :  { %908 = vmatpush3.bf16.msra.mxu0 %v948_v25 }
 0x11f   :  { %895 = vmatprep.mubr.bf16.mxu1 %v352_v60  ;;  %v360_v63 = vadd.f32 %v358_v61, %v356_v58  ;;  %v361_v0 = vadd.f32 %v359_v62, %v357_v59  ;;  %909 = vmatprep.subr.bf16.mxu0 %v1003_v5 }
 0x121   :  { %v362_v1 = vmax.f32 %v360_v63, 0.0  ;;  %v363_v2 = vmax.f32 %v361_v0, 0.0 }
 0x122   :  { %910 = vmatpush3.bf16.msra.mxu0 %v949_v9 }
 0x123   :  { %v364_v3 = vpack.c.bf16 %v363_v2, %v362_v1  ;;  %911 = vmatprep.subr.bf16.mxu0 %v1003_v5 }
 0x125   :  { %896 = vmatmul.mubr.bf16.gmra.mrb[12].mxu1 %v364_v3 }
 0x126   :  { %912 = vmatpush3.bf16.msra.mxu0 %v950_v10 }
 0x127   :  { %913 = vmatprep.subr.bf16.mxu0 %v1003_v5 }
 0x12a   :  { %914 = vmatpush3.bf16.msra.mxu0 %v951_v11 }
 0x1d4   :  { %v885_v12 = vpop.f32.mrb[0].mxu1 }
 0x1d5   :  { %v481_v14 = vpop.f32.mrb[1].mxu1  ;;  %v490_v16 = vadd.f32 %v885_v12, %v1173_v13 }
 0x1d6   :  { %v886_v15 = vpop.f32.mrb[2].mxu1  ;;  %v482_v21 = vadd.f32 %v1173_v13, %v481_v14 }
 0x1d7   :  { %v493_v17 = vadd.f32 %v886_v15, %v1173_v13  ;;  %v484_v18 = vpop.f32.mrb[3].mxu1 }
 0x1d8   :  { %v485_v22 = vadd.f32 %v1173_v13, %v484_v18 }
 0x1d9   :  { %v545_v23 = vpack.c.bf16 %v493_v17, %v490_v16 }
 0x1da   :  { %v544_v24 = vpack.c.bf16 %v485_v22, %v482_v21 }
 0x1db   :  { %v579_v35 = vunpack.c.l.bf16 %v545_v23  ;;  %v580_v36 = vunpack.c.h.bf16 %v545_v23 }
 0x1dc   :  { %v570_v27 = vunpack.c.l.bf16 %v544_v24  ;;  %v571_v28 = vunpack.c.h.bf16 %v544_v24 }
 0x1de   :  { %v574_v29 = vadd.f32 %v572_v26, %v570_v27  ;;  %v575_v30 = vadd.f32 %v572_v26, %v571_v28 }
 0x1e0   :  { %v576_v31 = vmax.f32 %v574_v29, 0.0  ;;  %v577_v32 = vmax.f32 %v575_v30, 0.0  ;;  %v889_v33 = vpop.f32.mrb[4].mxu1 }
 0x1e1   :  { %v497_v34 = vpop.f32.mrb[5].mxu1  ;;  %v506_v40 = vadd.f32 %v889_v33, %v1173_v13 }
 0x1e2   :  { %v581_v37 = vmul.f32 %v1180_v20, %v576_v31  ;;  %v582_v38 = vmul.f32 %v1180_v20, %v577_v32  ;;  %v890_v39 = vpop.f32.mrb[6].mxu1  ;;  %v498_v43 = vadd.f32 %v1173_v13, %v497_v34 }
 0x1e3   :  { %v509_v41 = vadd.f32 %v890_v39, %v1173_v13  ;;  %v500_v42 = vpop.f32.mrb[7].mxu1 }
 0x1e4   :  { %v501_v19 = vadd.f32 %v1173_v13, %v500_v42  ;;  %v583_v44 = vadd.f32 %v581_v37, %v579_v35  ;;  %v584_v45 = vadd.f32 %v582_v38, %v580_v36 }
 0x1e5   :  { %v547_v46 = vpack.c.bf16 %v509_v41, %v506_v40 }
 0x1e6   :  { %v546_v47 = vpack.c.bf16 %v501_v19, %v498_v43  ;;  %v585_v48 = vmax.f32 %v583_v44, 0.0  ;;  %v586_v49 = vmax.f32 %v584_v45, 0.0 }
 0x1e7   :  { %v597_v60 = vunpack.c.l.bf16 %v547_v46  ;;  %v598_v61 = vunpack.c.h.bf16 %v547_v46 }
 0x1e8   :  { %v588_v50 = vunpack.c.l.bf16 %v546_v47  ;;  %v589_v51 = vunpack.c.h.bf16 %v546_v47  ;;  %v590_v52 = vmul.f32 %v1180_v20, %v585_v48  ;;  %v591_v53 = vmul.f32 %v1180_v20, %v586_v49 }
 0x1ea   :  { %v592_v54 = vadd.f32 %v590_v52, %v588_v50  ;;  %v593_v55 = vadd.f32 %v591_v53, %v589_v51 }
 0x1ec   :  { %v594_v56 = vmax.f32 %v592_v54, 0.0  ;;  %v595_v57 = vmax.f32 %v593_v55, 0.0  ;;  %v893_v58 = vpop.f32.mrb[8].mxu1 }
 0x1ed   :  { %v513_v59 = vpop.f32.mrb[9].mxu1  ;;  %v522_v1 = vadd.f32 %v893_v58, %v1173_v13 }
 0x1ee   :  { %v599_v62 = vmul.f32 %v1180_v20, %v594_v56  ;;  %v600_v63 = vmul.f32 %v1180_v20, %v595_v57  ;;  %v894_v0 = vpop.f32.mrb[10].mxu1  ;;  %v514_v4 = vadd.f32 %v1173_v13, %v513_v59  ;;  %v806_v56 = vld [vmem:[%s1234_s8] ss:$0 sm:$0xff] }
 0x1ef   :  { %v525_v2 = vadd.f32 %v894_v0, %v1173_v13  ;;  %v516_v3 = vpop.f32.mrb[11].mxu1 }
 0x1f0   :  { %v517_v5 = vadd.f32 %v1173_v13, %v516_v3  ;;  %v601_v6 = vadd.f32 %v599_v62, %v597_v60  ;;  %v602_v7 = vadd.f32 %v600_v63, %v598_v61 }
 0x1f1   :  { %v549_v8 = vpack.c.bf16 %v525_v2, %v522_v1 }
 0x1f2   :  { %v548_v25 = vpack.c.bf16 %v517_v5, %v514_v4  ;;  %v603_v9 = vmax.f32 %v601_v6, 0.0  ;;  %v604_v10 = vmax.f32 %v602_v7, 0.0 }
 0x1f3   :  { %v615_v24 = vunpack.c.l.bf16 %v549_v8  ;;  %v616_v26 = vunpack.c.h.bf16 %v549_v8 }
 0x1f4   :  { %v606_v11 = vunpack.c.l.bf16 %v548_v25  ;;  %v607_v12 = vunpack.c.h.bf16 %v548_v25  ;;  %v608_v14 = vmul.f32 %v1180_v20, %v603_v9  ;;  %v609_v15 = vmul.f32 %v1180_v20, %v604_v10 }
 0x1f6   :  { %v610_v16 = vadd.f32 %v608_v14, %v606_v11  ;;  %v611_v17 = vadd.f32 %v609_v15, %v607_v12 }
 0x1f8   :  { %v612_v18 = vmax.f32 %v610_v16, 0.0  ;;  %v613_v21 = vmax.f32 %v611_v17, 0.0  ;;  %v897_v22 = vpop.f32.mrb[12].mxu1 }
 0x1f9   :  { %v529_v23 = vpop.f32.mrb[13].mxu1  ;;  %v538_v30 = vadd.f32 %v897_v22, %v1173_v13 }
 0x1fa   :  { %v617_v27 = vmul.f32 %v1180_v20, %v612_v18  ;;  %v618_v28 = vmul.f32 %v1180_v20, %v613_v21  ;;  %v898_v29 = vpop.f32.mrb[14].mxu1  ;;  %v530_v33 = vadd.f32 %v1173_v13, %v529_v23 }
 0x1fb   :  { %v541_v31 = vadd.f32 %v898_v29, %v1173_v13  ;;  %v532_v32 = vpop.f32.mrb[15].mxu1 }
 0x1fc   :  { %v533_v34 = vadd.f32 %v1173_v13, %v532_v32  ;;  %v619_v35 = vadd.f32 %v617_v27, %v615_v24  ;;  %v620_v36 = vadd.f32 %v618_v28, %v616_v26 }
 0x1fd   :  { %v551_v37 = vpack.c.bf16 %v541_v31, %v538_v30 }
 0x1fe   :  { %v550_v38 = vpack.c.bf16 %v533_v34, %v530_v33  ;;  %v621_v39 = vmax.f32 %v619_v35, 0.0  ;;  %v622_v40 = vmax.f32 %v620_v36, 0.0 }
 0x1ff   :  { %v633_v48 = vunpack.c.l.bf16 %v551_v37  ;;  %v634_v49 = vunpack.c.h.bf16 %v551_v37 }
 0x200   :  { %v624_v41 = vunpack.c.l.bf16 %v550_v38  ;;  %v625_v42 = vunpack.c.h.bf16 %v550_v38  ;;  %v626_v43 = vmul.f32 %v1180_v20, %v621_v39  ;;  %v627_v19 = vmul.f32 %v1180_v20, %v622_v40 }
 0x202   :  { %v628_v44 = vadd.f32 %v626_v43, %v624_v41  ;;  %v629_v45 = vadd.f32 %v627_v19, %v625_v42 }
 0x204   :  { %v630_v46 = vmax.f32 %v628_v44, 0.0  ;;  %v631_v47 = vmax.f32 %v629_v45, 0.0 }
 0x206   :  { %v635_v13 = vmul.f32 %v1180_v20, %v630_v46  ;;  %v636_v50 = vmul.f32 %v1180_v20, %v631_v47 }
 0x208   :  { %v637_v51 = vadd.f32 %v635_v13, %v633_v48  ;;  %v638_v52 = vadd.f32 %v636_v50, %v634_v49 }
 0x20a   :  { %v639_v53 = vmax.f32 %v637_v51, 0.0  ;;  %v640_v54 = vmax.f32 %v638_v52, 0.0 }
 0x20c   :  { %v646_v55 = vpack.c.bf16 %v640_v54, %v639_v53 }
 0x20e   :  { %916 = vmatmul.mubr.bf16.vlgmr.msra.gmra.mrb[16].mxu0 %v646_v55 }
 0x2e1   :  { %v752_v57 = vpop.f32.mrb[16].mxu0 }
 0x2e2   :  { %v753_v58 = vadd.f32 %v806_v56, %v752_v57  ;;  %v917_v59 = vpop.f32.mrb[17].mxu0 }
 0x2e3   :  { %v755_v60 = vpop.f32.mrb[18].mxu0 }
 0x2e4   :  { %759 = vst [vmem:[#allocation8] sm:$0xff] %v753_v58  ;;  %v756_v61 = vadd.f32 %v806_v56, %v755_v60  ;;  %v918_v20 = vpop.f32.mrb[19].mxu0 }
 0x2e6   :  { %760 = vst [vmem:[#allocation8 + $0x8] sm:$0xff] %v756_v61 }
 0x2e7   :  { %985 = shalt.err (!%p982_p12)
}
 0x2e8   :  { %s986_s19 = scalar_lea.hbm %s1235_s9, 256 }
 0x2e9   :  { %p987_p13 = scmp.ne.s32.totalorder %s1235_s9, %s986_s19  ;;  %p990_p0 = scmp.lt.u32.totalorder %s986_s19, %s1235_s9 }
 0x2eb   :  { %p992_p1 = pnand %p990_p0, %p987_p13 }
 0x2ed   :  { %995 = shalt.err (!%p992_p1)
}
 0x2ee   :  { %s1006_s24 = smov 128   ;;  %s1007_s25 = smov 8  }
 0x2ef   :  { %772 = dma.vmem_to_hbm [thread:$0]  %s767_s16, 256, %s1235_s9, [#allocation7], %s1006_s24, %s1006_s24, %s1007_s25  }
 0x2f0   :  { %998 = dma.done.wait [#allocation7], 256  }
 0x2f1   :  { %999 = vsyncadd [#allocation7], 4294967040 }
 0x2f2   :  { %776 = vsyncpa [#allocation6], 1 }
 0x2f3   :  { %777 = vsyncpa [#allocation7], 1 }

</bundles_post_ra>
